<compile_context>
chip_gen: v6e
topology: v6e:2x2x1
jax: 0.10.0
libtpu: 0.0.40
codegen_flags: <defaults>
</compile_context>

<pallas_src>
import functools

import jax
import jax.numpy as jnp
from jax.experimental import pallas as pl
from jax.experimental.pallas import tpu as pltpu


def _round_up(x, m):
    return (x + m - 1) // m * m


# ----------------------------------------------------------------------------
# Kernel 1: one power iteration -> (updated u, 1/sigma).  W/sigma is NOT built.
# Pure VPU/XLU work (broadcast + reductions); no MXU-wasting 1-row matmuls.
# ----------------------------------------------------------------------------
def _power_iter_kernel(w_ref, u_ref, u_out_ref, inv_sigma_ref):
    eps = 1e-12
    w = w_ref[...]                                     # (Cout, K) f32
    u = u_ref[...]                                     # (Cout, 1) f32
    # v = normalize(W^T u)
    v = jnp.sum(w * u, axis=0, keepdims=True)          # (1, K)
    v = v / jnp.maximum(jnp.sqrt(jnp.sum(v * v)), eps)
    # u' = normalize(W v)
    wv = jnp.sum(w * v, axis=1, keepdims=True)         # (Cout, 1)
    u_new = wv / jnp.maximum(jnp.sqrt(jnp.sum(wv * wv)), eps)
    # sigma = u'^T W v
    sigma = jnp.sum(u_new * wv)
    u_out_ref[...] = u_new
    inv_sigma_ref[...] = jnp.broadcast_to(1.0 / sigma, (1, 1))


def spectral_norm_stats(w_mat, u_col):
    """w_mat: (Cout, K) f32, u_col: (Cout, 1) f32 -> (u_new (Cout,1), inv_sigma (1,1))."""
    cout, k = w_mat.shape
    return pl.pallas_call(
        _power_iter_kernel,
        out_shape=(
            jax.ShapeDtypeStruct((cout, 1), jnp.float32),
            jax.ShapeDtypeStruct((1, 1), jnp.float32),
        ),
        in_specs=[
            pl.BlockSpec((cout, k), lambda: (0, 0)),
            pl.BlockSpec((cout, 1), lambda: (0, 0)),
        ],
        out_specs=(
            pl.BlockSpec((cout, 1), lambda: (0, 0)),
            pl.BlockSpec((1, 1), lambda: (0, 0)),
        ),
    )(w_mat, u_col)


# ----------------------------------------------------------------------------
# Kernel 2: fused im2col conv + (1/sigma) scale + bias.
#   x_ref : (1, 1, Cin_pad, span)  bf16  flattened padded spatial, per row-tile
#   w_ref : (kh*kw, Cout, Cin_pad) bf16  per-tap weight slabs
#   b_ref : (Cout, 1)              f32
#   s_ref : (1, 1)                 f32   1/sigma scalar (SMEM)
#   o_ref : (1, Cout, tile_m)      f32   channels-first, lane-dense spatial axis
# ----------------------------------------------------------------------------
def _conv_taps_kernel(x_ref, w_ref, b_ref, s_ref, o_ref, *, kh, kw, wp, tile_m):
    cout = w_ref.shape[1]
    acc = jnp.zeros((cout, tile_m), jnp.float32)       # ~3 vregs for Cout=8
    for t in range(kh * kw):                           # unrolled tap reduction
        dy, dx = divmod(t, kw)
        off = dy * wp + dx                             # static lane shift per tap
        rhs = x_ref[0, 0, :, off:off + tile_m]         # (Cin_pad, tile_m) bf16
        acc = acc + jnp.dot(w_ref[t], rhs, preferred_element_type=jnp.float32)
    inv_sigma = s_ref[0, 0]                            # SMEM scalar: fold 1/sigma here
    o_ref[0] = (acc * inv_sigma + b_ref[...]).astype(o_ref.dtype)


# ----------------------------------------------------------------------------
# Wrapper: SpectralNorm(Conv2d) forward
# ----------------------------------------------------------------------------
def spectral_norm_conv2d(x, weight, bias, u, *, padding=1, tm=512):
    """x: (N,Cin,H,W), weight: (Cout,Cin,kh,kw), bias: (Cout,), u: (Cout,).

    Returns (y_nchw, u_new).  u_new mirrors PyTorch's updated power-iteration buffer.
    """
    n, cin, h, w = x.shape
    cout, _, kh, kw = weight.shape

    # --- kernel 1: power iteration -> (u', 1/sigma); W/sigma never materialized ---
    w_mat = weight.reshape(cout, cin * kh * kw).astype(jnp.float32)
    u_new, inv_sigma = spectral_norm_stats(
        w_mat, u.reshape(cout, 1).astype(jnp.float32))

    # --- layout prep (tiny weight relayout; activations stay NCHW: pad + flatten) ---
    cin_pad = _round_up(cin, 8)
    # per-tap weight slabs: w_taps[t, co, ci] = weight[co, ci, dy, dx],  t = dy*kw+dx
    w_taps = jnp.transpose(weight, (2, 3, 0, 1)).reshape(kh * kw, cout, cin)
    w_taps = jnp.pad(w_taps, ((0, 0), (0, 0), (0, cin_pad - cin))).astype(jnp.bfloat16)
    bias_col = bias.astype(jnp.float32).reshape(cout, 1)

    hp, wp = h + 2 * padding, w + 2 * padding
    x_sp = jnp.pad(x, ((0, 0), (0, cin_pad - cin),
                       (padding, padding), (padding, padding)))
    x_flat = x_sp.reshape(n, cin_pad, hp * wp).astype(jnp.bfloat16)

    # Flattened output rows keep the padded width wp; the per-row "garbage" columns
    # (and any rows added to reach tile_m) are sliced away after the kernel.
    m_rows = h * wp
    tile_m = min(_round_up(tm, 128), _round_up(m_rows, 128))    # lane-dense stores
    n_tiles = -(-m_rows // tile_m)
    m_pad = n_tiles * tile_m
    span = tile_m + (kh - 1) * wp + (kw - 1)                    # per-tile input window
    l_total = (n_tiles - 1) * tile_m + span
    x_flat = jnp.pad(x_flat, ((0, 0), (0, 0), (0, max(0, l_total - hp * wp))))
    # overlapping row-tiles (<= ~7% duplication; exactly one tile for small images)
    x_tiles = jnp.stack(
        [x_flat[:, :, r * tile_m:r * tile_m + span] for r in range(n_tiles)], axis=1)

    out = pl.pallas_call(
        functools.partial(_conv_taps_kernel, kh=kh, kw=kw, wp=wp, tile_m=tile_m),
        out_shape=jax.ShapeDtypeStruct((n, cout, m_pad), jnp.float32),
        grid=(n, n_tiles),
        in_specs=[
            pl.BlockSpec((1, 1, cin_pad, span), lambda b, r: (b, r, 0, 0)),
            pl.BlockSpec((kh * kw, cout, cin_pad), lambda b, r: (0, 0, 0)),
            pl.BlockSpec((cout, 1), lambda b, r: (0, 0)),
            pl.BlockSpec(memory_space=pltpu.MemorySpace.SMEM),  # 1/sigma scalar
        ],
        out_specs=pl.BlockSpec((1, cout, tile_m), lambda b, r: (b, 0, r)),
        compiler_params=pltpu.CompilerParams(
            dimension_semantics=("parallel", "parallel"),
            vmem_limit_bytes=48 * 1024 * 1024,   # explicit: > v5e default, < v7x 64MiB
        ),
    )(x_tiles, w_taps, bias_col, inv_sigma)

    # Strip garbage rows/columns; the result is already NCHW (no relayout pass).
    # TODO(synk): in a full model, keep this flattened channels-first layout and fuse
    # the crop into the next consumer instead of slicing here.
    y = out[:, :, :m_rows].reshape(n, cout, h, wp)[:, :, :, :w]
    return y, u_new.reshape(cout)


# ----------------------------------------------------------------------------
# Reference in plain JAX (correctness check)
# ----------------------------------------------------------------------------
def _reference(x, weight, bias, u, *, padding=1):
    eps = 1e-12
    cout = weight.shape[0]
    w_mat = weight.reshape(cout, -1)
    v = w_mat.T @ u
    v = v / jnp.maximum(jnp.linalg.norm(v), eps)
    u_new = w_mat @ v
    u_new = u_new / jnp.maximum(jnp.linalg.norm(u_new), eps)
    sigma = u_new @ w_mat @ v
    w_sn = weight / sigma
    y = jax.lax.conv_general_dilated(
        x, w_sn, window_strides=(1, 1),
        padding=[(padding, padding), (padding, padding)],
        dimension_numbers=("NCHW", "OIHW", "NCHW"),
    )
    return y + bias.reshape(1, cout, 1, 1), u_new


if __name__ == "__main__":
    key = jax.random.PRNGKey(0)
    k_x, k_w, k_b, k_u = jax.random.split(key, 4)

    N, Cin, H, W = 2, 4, 16, 16
    Cout, KH, KW = 8, 3, 3

    x = jax.random.normal(k_x, (N, Cin, H, W), dtype=jnp.float32)
    weight = jax.random.normal(k_w, (Cout, Cin, KH, KW), dtype=jnp.float32) * 0.1
    bias = jax.random.normal(k_b, (Cout,), dtype=jnp.float32) * 0.05
    u = jax.random.normal(k_u, (Cout,), dtype=jnp.float32)
    u = u / jnp.maximum(jnp.linalg.norm(u), 1e-12)

    y, u_new = jax.jit(spectral_norm_conv2d)(x, weight, bias, u)
    y = jax.block_until_ready(y)

    y_ref, u_ref = _reference(x, weight, bias, u)
    assert y.shape == (N, Cout, H, W)
    # power iteration runs in f32 -> tight tolerance
    assert jnp.allclose(u_new, u_ref, atol=1e-4, rtol=1e-4), "u mismatch vs reference"
    # conv hot path runs in bf16 on the MXU (f32 accumulation) -> looser tolerance
    assert jnp.allclose(y, y_ref, atol=5e-2, rtol=5e-2), "y mismatch vs reference"

    print("KERNEL_OK")
</pallas_src>

<mosaic_0001>
module attributes {stable_mosaic.version = 11 : i64} {
  func.func @_power_iter_kernel(%arg0: memref<8x36xf32, #tpu.memory_space<vmem>>, %arg1: memref<8x1xf32, #tpu.memory_space<vmem>>, %arg2: memref<8x1xf32, #tpu.memory_space<vmem>>, %arg3: memref<1x1xf32, #tpu.memory_space<vmem>>) attributes {dimension_semantics = [], scalar_prefetch = 0 : i64, scratch_operands = 0 : i64, tpu.core_type = #tpu.core_type<tc>} {
    %c0 = arith.constant 0 : index
    %c0_0 = arith.constant 0 : index
    %0 = vector.load %arg0[%c0, %c0_0] : memref<8x36xf32, #tpu.memory_space<vmem>>, vector<8x36xf32>
    %c0_1 = arith.constant 0 : index
    %c0_2 = arith.constant 0 : index
    %1 = vector.load %arg1[%c0_1, %c0_2] : memref<8x1xf32, #tpu.memory_space<vmem>>, vector<8x1xf32>
    %2 = vector.broadcast %1 : vector<8x1xf32> to vector<8x36xf32>
    %3 = arith.mulf %0, %2 : vector<8x36xf32>
    %cst = arith.constant dense<0.000000e+00> : vector<36xf32>
    %4 = vector.multi_reduction <add>, %3, %cst [0] : vector<8x36xf32> to vector<36xf32>
    %5 = vector.shape_cast %4 : vector<36xf32> to vector<1x36xf32>
    %6 = arith.mulf %5, %5 : vector<1x36xf32>
    %7 = vector.shape_cast %6 : vector<1x36xf32> to vector<1x1x36xf32>
    %cst_3 = arith.constant dense<0.000000e+00> : vector<1xf32>
    %8 = vector.multi_reduction <add>, %7, %cst_3 [1, 2] : vector<1x1x36xf32> to vector<1xf32>
    %9 = vector.shape_cast %8 : vector<1xf32> to vector<1x1x1xf32>
    %10 = vector.extract %9[0, 0, 0] : f32 from vector<1x1x1xf32>
    %11 = math.sqrt %10 : f32
    %cst_4 = arith.constant 9.99999996E-13 : f32
    %12 = arith.maximumf %11, %cst_4 : f32
    %13 = vector.broadcast %12 : f32 to vector<1x36xf32>
    %14 = arith.divf %5, %13 : vector<1x36xf32>
    %15 = vector.broadcast %14 : vector<1x36xf32> to vector<8x36xf32>
    %16 = arith.mulf %0, %15 : vector<8x36xf32>
    %cst_5 = arith.constant dense<0.000000e+00> : vector<8xf32>
    %17 = vector.multi_reduction <add>, %16, %cst_5 [1] : vector<8x36xf32> to vector<8xf32>
    %18 = vector.shape_cast %17 : vector<8xf32> to vector<8x1xf32>
    %19 = arith.mulf %18, %18 : vector<8x1xf32>
    %20 = vector.shape_cast %19 : vector<8x1xf32> to vector<1x8x1xf32>
    %cst_6 = arith.constant dense<0.000000e+00> : vector<1xf32>
    %21 = vector.multi_reduction <add>, %20, %cst_6 [1, 2] : vector<1x8x1xf32> to vector<1xf32>
    %22 = vector.shape_cast %21 : vector<1xf32> to vector<1x1x1xf32>
    %23 = vector.extract %22[0, 0, 0] : f32 from vector<1x1x1xf32>
    %24 = math.sqrt %23 : f32
    %cst_7 = arith.constant 9.99999996E-13 : f32
    %25 = arith.maximumf %24, %cst_7 : f32
    %26 = vector.broadcast %25 : f32 to vector<8x1xf32>
    %27 = arith.divf %18, %26 : vector<8x1xf32>
    %28 = arith.mulf %27, %18 : vector<8x1xf32>
    %29 = vector.shape_cast %28 : vector<8x1xf32> to vector<1x8x1xf32>
    %cst_8 = arith.constant dense<0.000000e+00> : vector<1xf32>
    %30 = vector.multi_reduction <add>, %29, %cst_8 [1, 2] : vector<1x8x1xf32> to vector<1xf32>
    %31 = vector.shape_cast %30 : vector<1xf32> to vector<1x1x1xf32>
    %32 = vector.extract %31[0, 0, 0] : f32 from vector<1x1x1xf32>
    %c0_9 = arith.constant 0 : index
    %c0_10 = arith.constant 0 : index
    %33 = vector.load %arg2[%c0_9, %c0_10] : memref<8x1xf32, #tpu.memory_space<vmem>>, vector<8x1xf32>
    tpu.vector_store %arg2[%c0_9, %c0_10], %27 {strides = array<i32>} : memref<8x1xf32, #tpu.memory_space<vmem>>, vector<8x1xf32>,
    %cst_11 = arith.constant 1.000000e+00 : f32
    %34 = arith.divf %cst_11, %32 : f32
    %35 = vector.broadcast %34 : f32 to vector<1x1xf32>
    %c0_12 = arith.constant 0 : index
    %c0_13 = arith.constant 0 : index
    %36 = vector.load %arg3[%c0_12, %c0_13] : memref<1x1xf32, #tpu.memory_space<vmem>>, vector<1x1xf32>
    tpu.vector_store %arg3[%c0_12, %c0_13], %35 {strides = array<i32>} : memref<1x1xf32, #tpu.memory_space<vmem>>, vector<1x1xf32>,
    return
  }
}

module attributes {stable_mosaic.version = 11 : i64} {
  func.func @_conv_taps_kernel(%arg0: i32, %arg1: i32, %arg2: memref<1x1x8x422xbf16, #tpu.memory_space<vmem>>, %arg3: memref<9x8x8xbf16, #tpu.memory_space<vmem>>, %arg4: memref<8x1xf32, #tpu.memory_space<vmem>>, %arg5: memref<1x1xf32, #tpu.memory_space<smem>>, %arg6: memref<1x8x384xf32, #tpu.memory_space<vmem>>) attributes {dimension_semantics = [#tpu.dimension_semantics<parallel>, #tpu.dimension_semantics<parallel>], iteration_bounds = array<i64: 2, 1>, scalar_prefetch = 0 : i64, scratch_operands = 0 : i64, tpu.core_type = #tpu.core_type<tc>, window_params = [{transform_indices = @transform_0, window_bounds = array<i64: 1, 1, 8, 422>}, {pipeline_mode = #tpu.pipeline_mode<synchronous>, transform_indices = @transform_1, window_bounds = array<i64: 9, 8, 8>}, {pipeline_mode = #tpu.pipeline_mode<synchronous>, transform_indices = @transform_2, window_bounds = array<i64: 8, 1>}, {transform_indices = @transform_3, window_bounds = array<i64: 1, 1>}, {transform_indices = @transform_4, window_bounds = array<i64: 1, 8, 384>}]} {
    %cst = arith.constant 0.000000e+00 : f32
    %0 = vector.broadcast %cst : f32 to vector<8x384xf32>
    %c0 = arith.constant 0 : index
    %c0_0 = arith.constant 0 : index
    %c0_1 = arith.constant 0 : index
    %c0_2 = arith.constant 0 : index
    %1 = vector.load %arg2[%c0, %c0_0, %c0_1, %c0_2] : memref<1x1x8x422xbf16, #tpu.memory_space<vmem>>, vector<1x1x8x384xbf16>
    %2 = vector.shape_cast %1 : vector<1x1x8x384xbf16> to vector<8x384xbf16>
    %c0_3 = arith.constant 0 : index
    %c0_4 = arith.constant 0 : index
    %c0_5 = arith.constant 0 : index
    %3 = vector.load %arg3[%c0_3, %c0_4, %c0_5] : memref<9x8x8xbf16, #tpu.memory_space<vmem>>, vector<1x8x8xbf16>
    %4 = vector.shape_cast %3 : vector<1x8x8xbf16> to vector<8x8xbf16>
    %cst_6 = arith.constant dense<0.000000e+00> : vector<8x384xf32>
    %5 = tpu.matmul %4, %2, %cst_6 {dimension_numbers = #tpu.dot_dimension_numbers<[1], [0], [0], [1], [0, 0, 1, 1], [], []>} : vector<8x8xbf16>, vector<8x384xbf16>, vector<8x384xf32> -> vector<8x384xf32>
    %6 = arith.addf %0, %5 : vector<8x384xf32>
    %c0_7 = arith.constant 0 : index
    %c0_8 = arith.constant 0 : index
    %c0_9 = arith.constant 0 : index
    %c1 = arith.constant 1 : index
    %7 = vector.load %arg2[%c0_7, %c0_8, %c0_9, %c1] : memref<1x1x8x422xbf16, #tpu.memory_space<vmem>>, vector<1x1x8x384xbf16>
    %8 = vector.shape_cast %7 : vector<1x1x8x384xbf16> to vector<8x384xbf16>
    %c1_10 = arith.constant 1 : index
    %c0_11 = arith.constant 0 : index
    %c0_12 = arith.constant 0 : index
    %9 = vector.load %arg3[%c1_10, %c0_11, %c0_12] : memref<9x8x8xbf16, #tpu.memory_space<vmem>>, vector<1x8x8xbf16>
    %10 = vector.shape_cast %9 : vector<1x8x8xbf16> to vector<8x8xbf16>
    %cst_13 = arith.constant dense<0.000000e+00> : vector<8x384xf32>
    %11 = tpu.matmul %10, %8, %cst_13 {dimension_numbers = #tpu.dot_dimension_numbers<[1], [0], [0], [1], [0, 0, 1, 1], [], []>} : vector<8x8xbf16>, vector<8x384xbf16>, vector<8x384xf32> -> vector<8x384xf32>
    %12 = arith.addf %6, %11 : vector<8x384xf32>
    %c0_14 = arith.constant 0 : index
    %c0_15 = arith.constant 0 : index
    %c0_16 = arith.constant 0 : index
    %c2 = arith.constant 2 : index
    %13 = vector.load %arg2[%c0_14, %c0_15, %c0_16, %c2] : memref<1x1x8x422xbf16, #tpu.memory_space<vmem>>, vector<1x1x8x384xbf16>
    %14 = vector.shape_cast %13 : vector<1x1x8x384xbf16> to vector<8x384xbf16>
    %c2_17 = arith.constant 2 : index
    %c0_18 = arith.constant 0 : index
    %c0_19 = arith.constant 0 : index
    %15 = vector.load %arg3[%c2_17, %c0_18, %c0_19] : memref<9x8x8xbf16, #tpu.memory_space<vmem>>, vector<1x8x8xbf16>
    %16 = vector.shape_cast %15 : vector<1x8x8xbf16> to vector<8x8xbf16>
    %cst_20 = arith.constant dense<0.000000e+00> : vector<8x384xf32>
    %17 = tpu.matmul %16, %14, %cst_20 {dimension_numbers = #tpu.dot_dimension_numbers<[1], [0], [0], [1], [0, 0, 1, 1], [], []>} : vector<8x8xbf16>, vector<8x384xbf16>, vector<8x384xf32> -> vector<8x384xf32>
    %18 = arith.addf %12, %17 : vector<8x384xf32>
    %c0_21 = arith.constant 0 : index
    %c0_22 = arith.constant 0 : index
    %c0_23 = arith.constant 0 : index
    %c18 = arith.constant 18 : index
    %19 = vector.load %arg2[%c0_21, %c0_22, %c0_23, %c18] : memref<1x1x8x422xbf16, #tpu.memory_space<vmem>>, vector<1x1x8x384xbf16>
    %20 = vector.shape_cast %19 : vector<1x1x8x384xbf16> to vector<8x384xbf16>
    %c3 = arith.constant 3 : index
    %c0_24 = arith.constant 0 : index
    %c0_25 = arith.constant 0 : index
    %21 = vector.load %arg3[%c3, %c0_24, %c0_25] : memref<9x8x8xbf16, #tpu.memory_space<vmem>>, vector<1x8x8xbf16>
    %22 = vector.shape_cast %21 : vector<1x8x8xbf16> to vector<8x8xbf16>
    %cst_26 = arith.constant dense<0.000000e+00> : vector<8x384xf32>
    %23 = tpu.matmul %22, %20, %cst_26 {dimension_numbers = #tpu.dot_dimension_numbers<[1], [0], [0], [1], [0, 0, 1, 1], [], []>} : vector<8x8xbf16>, vector<8x384xbf16>, vector<8x384xf32> -> vector<8x384xf32>
    %24 = arith.addf %18, %23 : vector<8x384xf32>
    %c0_27 = arith.constant 0 : index
    %c0_28 = arith.constant 0 : index
    %c0_29 = arith.constant 0 : index
    %c19 = arith.constant 19 : index
    %25 = vector.load %arg2[%c0_27, %c0_28, %c0_29, %c19] : memref<1x1x8x422xbf16, #tpu.memory_space<vmem>>, vector<1x1x8x384xbf16>
    %26 = vector.shape_cast %25 : vector<1x1x8x384xbf16> to vector<8x384xbf16>
    %c4 = arith.constant 4 : index
    %c0_30 = arith.constant 0 : index
    %c0_31 = arith.constant 0 : index
    %27 = vector.load %arg3[%c4, %c0_30, %c0_31] : memref<9x8x8xbf16, #tpu.memory_space<vmem>>, vector<1x8x8xbf16>
    %28 = vector.shape_cast %27 : vector<1x8x8xbf16> to vector<8x8xbf16>
    %cst_32 = arith.constant dense<0.000000e+00> : vector<8x384xf32>
    %29 = tpu.matmul %28, %26, %cst_32 {dimension_numbers = #tpu.dot_dimension_numbers<[1], [0], [0], [1], [0, 0, 1, 1], [], []>} : vector<8x8xbf16>, vector<8x384xbf16>, vector<8x384xf32> -> vector<8x384xf32>
    %30 = arith.addf %24, %29 : vector<8x384xf32>
    %c0_33 = arith.constant 0 : index
    %c0_34 = arith.constant 0 : index
    %c0_35 = arith.constant 0 : index
    %c20 = arith.constant 20 : index
    %31 = vector.load %arg2[%c0_33, %c0_34, %c0_35, %c20] : memref<1x1x8x422xbf16, #tpu.memory_space<vmem>>, vector<1x1x8x384xbf16>
    %32 = vector.shape_cast %31 : vector<1x1x8x384xbf16> to vector<8x384xbf16>
    %c5 = arith.constant 5 : index
    %c0_36 = arith.constant 0 : index
    %c0_37 = arith.constant 0 : index
    %33 = vector.load %arg3[%c5, %c0_36, %c0_37] : memref<9x8x8xbf16, #tpu.memory_space<vmem>>, vector<1x8x8xbf16>
    %34 = vector.shape_cast %33 : vector<1x8x8xbf16> to vector<8x8xbf16>
    %cst_38 = arith.constant dense<0.000000e+00> : vector<8x384xf32>
    %35 = tpu.matmul %34, %32, %cst_38 {dimension_numbers = #tpu.dot_dimension_numbers<[1], [0], [0], [1], [0, 0, 1, 1], [], []>} : vector<8x8xbf16>, vector<8x384xbf16>, vector<8x384xf32> -> vector<8x384xf32>
    %36 = arith.addf %30, %35 : vector<8x384xf32>
    %c0_39 = arith.constant 0 : index
    %c0_40 = arith.constant 0 : index
    %c0_41 = arith.constant 0 : index
    %c36 = arith.constant 36 : index
    %37 = vector.load %arg2[%c0_39, %c0_40, %c0_41, %c36] : memref<1x1x8x422xbf16, #tpu.memory_space<vmem>>, vector<1x1x8x384xbf16>
    %38 = vector.shape_cast %37 : vector<1x1x8x384xbf16> to vector<8x384xbf16>
    %c6 = arith.constant 6 : index
    %c0_42 = arith.constant 0 : index
    %c0_43 = arith.constant 0 : index
    %39 = vector.load %arg3[%c6, %c0_42, %c0_43] : memref<9x8x8xbf16, #tpu.memory_space<vmem>>, vector<1x8x8xbf16>
    %40 = vector.shape_cast %39 : vector<1x8x8xbf16> to vector<8x8xbf16>
    %cst_44 = arith.constant dense<0.000000e+00> : vector<8x384xf32>
    %41 = tpu.matmul %40, %38, %cst_44 {dimension_numbers = #tpu.dot_dimension_numbers<[1], [0], [0], [1], [0, 0, 1, 1], [], []>} : vector<8x8xbf16>, vector<8x384xbf16>, vector<8x384xf32> -> vector<8x384xf32>
    %42 = arith.addf %36, %41 : vector<8x384xf32>
    %c0_45 = arith.constant 0 : index
    %c0_46 = arith.constant 0 : index
    %c0_47 = arith.constant 0 : index
    %c37 = arith.constant 37 : index
    %43 = vector.load %arg2[%c0_45, %c0_46, %c0_47, %c37] : memref<1x1x8x422xbf16, #tpu.memory_space<vmem>>, vector<1x1x8x384xbf16>
    %44 = vector.shape_cast %43 : vector<1x1x8x384xbf16> to vector<8x384xbf16>
    %c7 = arith.constant 7 : index
    %c0_48 = arith.constant 0 : index
    %c0_49 = arith.constant 0 : index
    %45 = vector.load %arg3[%c7, %c0_48, %c0_49] : memref<9x8x8xbf16, #tpu.memory_space<vmem>>, vector<1x8x8xbf16>
    %46 = vector.shape_cast %45 : vector<1x8x8xbf16> to vector<8x8xbf16>
    %cst_50 = arith.constant dense<0.000000e+00> : vector<8x384xf32>
    %47 = tpu.matmul %46, %44, %cst_50 {dimension_numbers = #tpu.dot_dimension_numbers<[1], [0], [0], [1], [0, 0, 1, 1], [], []>} : vector<8x8xbf16>, vector<8x384xbf16>, vector<8x384xf32> -> vector<8x384xf32>
    %48 = arith.addf %42, %47 : vector<8x384xf32>
    %c0_51 = arith.constant 0 : index
    %c0_52 = arith.constant 0 : index
    %c0_53 = arith.constant 0 : index
    %c38 = arith.constant 38 : index
    %49 = vector.load %arg2[%c0_51, %c0_52, %c0_53, %c38] : memref<1x1x8x422xbf16, #tpu.memory_space<vmem>>, vector<1x1x8x384xbf16>
    %50 = vector.shape_cast %49 : vector<1x1x8x384xbf16> to vector<8x384xbf16>
    %c8 = arith.constant 8 : index
    %c0_54 = arith.constant 0 : index
    %c0_55 = arith.constant 0 : index
    %51 = vector.load %arg3[%c8, %c0_54, %c0_55] : memref<9x8x8xbf16, #tpu.memory_space<vmem>>, vector<1x8x8xbf16>
    %52 = vector.shape_cast %51 : vector<1x8x8xbf16> to vector<8x8xbf16>
    %cst_56 = arith.constant dense<0.000000e+00> : vector<8x384xf32>
    %53 = tpu.matmul %52, %50, %cst_56 {dimension_numbers = #tpu.dot_dimension_numbers<[1], [0], [0], [1], [0, 0, 1, 1], [], []>} : vector<8x8xbf16>, vector<8x384xbf16>, vector<8x384xf32> -> vector<8x384xf32>
    %54 = arith.addf %48, %53 : vector<8x384xf32>
    %c0_57 = arith.constant 0 : index
    %c0_58 = arith.constant 0 : index
    %55 = memref.load %arg5[%c0_57, %c0_58] : memref<1x1xf32, #tpu.memory_space<smem>>
    %56 = vector.broadcast %55 : f32 to vector<8x384xf32>
    %57 = arith.mulf %54, %56 : vector<8x384xf32>
    %c0_59 = arith.constant 0 : index
    %c0_60 = arith.constant 0 : index
    %58 = vector.load %arg4[%c0_59, %c0_60] : memref<8x1xf32, #tpu.memory_space<vmem>>, vector<8x1xf32>
    %59 = vector.broadcast %58 : vector<8x1xf32> to vector<8x384xf32>
    %60 = arith.addf %57, %59 : vector<8x384xf32>
    %c0_61 = arith.constant 0 : index
    %c0_62 = arith.constant 0 : index
    %c0_63 = arith.constant 0 : index
    %61 = vector.load %arg6[%c0_61, %c0_62, %c0_63] : memref<1x8x384xf32, #tpu.memory_space<vmem>>, vector<1x8x384xf32>
    %62 = vector.shape_cast %61 : vector<1x8x384xf32> to vector<8x384xf32>
    %63 = vector.shape_cast %60 : vector<8x384xf32> to vector<1x8x384xf32>
    tpu.vector_store %arg6[%c0_61, %c0_62, %c0_63], %63 {strides = array<i32>} : memref<1x8x384xf32, #tpu.memory_space<vmem>>, vector<1x8x384xf32>,
    return
  }
  func.func @transform_0(%arg0: i32, %arg1: i32) -> (i32, i32, i32, i32) {
    %c0_i32 = arith.constant 0 : i32
    %c0_i32_0 = arith.constant 0 : i32
    %c0_i32_1 = arith.constant 0 : i32
    return %arg0, %arg1, %c0_i32, %c0_i32_0 : i32, i32, i32, i32
  }
  func.func @transform_1(%arg0: i32, %arg1: i32) -> (i32, i32, i32) {
    %c0_i32 = arith.constant 0 : i32
    %c0_i32_0 = arith.constant 0 : i32
    %c0_i32_1 = arith.constant 0 : i32
    %c0_i32_2 = arith.constant 0 : i32
    return %c0_i32, %c0_i32_0, %c0_i32_1 : i32, i32, i32
  }
  func.func @transform_2(%arg0: i32, %arg1: i32) -> (i32, i32) {
    %c0_i32 = arith.constant 0 : i32
    %c0_i32_0 = arith.constant 0 : i32
    %c0_i32_1 = arith.constant 0 : i32
    return %c0_i32, %c0_i32_0 : i32, i32
  }
  func.func @transform_3(%arg0: i32, %arg1: i32) -> (i32, i32) {
    %c0_i32 = arith.constant 0 : i32
    %c0_i32_0 = arith.constant 0 : i32
    %c0_i32_1 = arith.constant 0 : i32
    return %c0_i32, %c0_i32_0 : i32, i32
  }
  func.func @transform_4(%arg0: i32, %arg1: i32) -> (i32, i32, i32) {
    %c0_i32 = arith.constant 0 : i32
    %c0_i32_0 = arith.constant 0 : i32
    return %arg0, %c0_i32, %arg1 : i32, i32, i32
  }
}

</mosaic_0001>

<bundles_post_ra>
// kernel: spectral_norm_conv2d.2
= control target key start
LH: loop header
LB: loop body
LE: loop exit
PB: predicated region body
PF: predicated region fallthrough
CT: control target
= control target key end

     0   :  { %s210_s0 = inlined_call_operand.vmem [shape: f32[8,36], index: 0, kind: input, shape index: {}]   ;;  %s211_s1 = inlined_call_operand.vmem [shape: f32[8,1], index: 1, kind: input, shape index: {}]   ;;  %s212_s2 = inlined_call_operand.vmem [shape: f32[8,1], index: 2, kind: output, shape index: {0}]   ;;  %s213_s3 = inlined_call_operand.hbm [shape: f32[1,1], index: 3, kind: output, shape index: {1}]  }
   0x1   :  { %v15_v0 = vld [vmem:[%s211_s1] sm:$0xff] }
   0x2   :  { %9 = vsyncpa [#allocation3], 0  ;;  %v168_v1 = vmov 0   ;;  %v14_v2 = vld [vmem:[%s210_s0] sm:$0xff]  ;;  %vm22_vm0 = vcmask 293888   ;;  %vm31_vm1 = vcmask 286720  }
   0x3   :  { %135 = vset.pattern.permute.xlu0 %v168_v1  ;;  %s169_s16 = smov 1e-12   ;;  %vm60_vm4 = vcmask 7168   ;;  %s170_s24 = smov [#allocation2]   ;;  %vm100_vm7 = vcmask 0  }
   0x4   :  { %18 = vperm.xlu0 %135, %v15_v0   ;;  %s110_s25 = sshll.u32 %s170_s24, 4  ;;  %s111_s25 = int_to_ptr.vmem [resolvable:$true] %s110_s25 }
   0x5   :  { %s146_s26 = scalar_lea.vmem %s111_s25, 16  ;;  %s150_s27 = scalar_lea.vmem %s111_s25, 32 }
   0x6   :  { %p147_p0 = scmp.ne.s32.totalorder %s111_s25, %s146_s26  ;;  %p151_p1 = scmp.lt.s32.totalorder %s111_s25, %s111_s25 }
   0x7   :  { %p152_p2 = scmp.lt.s32.totalorder %s150_s27, %s146_s26 }
   0x9   :  { %p153_p3 = por %p152_p2, %p151_p1 }
   0xb   :  { %p154_p4 = pnand %p153_p3, %p147_p0 }
  0x7f   :  { %v19_v3 = vpop.permute.xlu0 %18 }
  0x80   :  { %v21_v4 = vmul.f32 %v19_v3, %v14_v2 }
  0x82   :  { %v23_v5 = vsel %vm22_vm0, %v21_v4, 0.0 }
  0x83   :  { %v24_v6 = vrot.slane %v23_v5, 4 }
  0x85   :  { %v25_v7 = vadd.f32 %v24_v6, %v23_v5 }
  0x87   :  { %v26_v8 = vrot.slane %v25_v7, 2 }
  0x89   :  { %v27_v9 = vadd.f32 %v26_v8, %v25_v7 }
  0x8b   :  { %v28_v10 = vrot.slane %v27_v9, 1 }
  0x8d   :  { %v29_v11 = vadd.f32 %v28_v10, %v27_v9 }
  0x8f   :  { %v30_v12 = vmul.f32 %v29_v11, %v29_v11 }
  0x91   :  { %v32_v13 = vsel %vm31_vm1, %v30_v12, 0.0 }
  0x92   :  { %33 = vadd.xlane.f32.xlu0 %v32_v13 }
 0x11b   :  { %v34_v14 = vpop.xlane.xlu0 %33 }
 0x11c   :  { %v35_v15 = vrot.slane %v34_v14, 4 }
 0x11e   :  { %v36_v16 = vadd.f32 %v35_v15, %v34_v14 }
 0x120   :  { %v37_v17 = vrot.slane %v36_v16, 2 }
 0x122   :  { %v38_v18 = vadd.f32 %v37_v17, %v36_v16 }
 0x124   :  { %v39_v19 = vrot.slane %v38_v18, 1 }
 0x126   :  { %v40_v20 = vadd.f32 %v39_v19, %v38_v18 }
 0x128   :  { %120 = vpush %v40_v20 }
 0x159   :  { %s121_s0 = spop %120 }
 0x15a   :  { %v42_v21 = vstv %s121_s0 }
 0x15b   :  { %136 = vrsqrt.f32 %v42_v21  ;;  %vm45_vm2 = vcmp.eq.f32.partialorder %v42_v21, inf  ;;  %v48_v24 = vand.u32 2147483648, %v42_v21  ;;  %vm47_vm3 = vcmp.eq.f32.partialorder %v42_v21, 0.0 }
 0x168   :  { %v137_v22 = vpop.eup %136 }
 0x169   :  { %v44_v23 = vmul.f32 %v137_v22, %v42_v21 }
 0x16b   :  { %v46_v25 = vsel %vm45_vm2, %v42_v21, %v44_v23 }
 0x16c   :  { %v49_v26 = vsel %vm47_vm3, %v48_v24, %v46_v25 }
 0x16d   :  { %122 = vpush %v49_v26 }
 0x19e   :  { %s123_s1 = spop %122 }
 0x19f   :  { %s51_s17 = smax.f32 %s169_s16, %s123_s1 }
 0x1a0   :  { %v52_v27 = vstv %s51_s17 }
 0x1a1   :  { %138 = vrcp.f32 %v52_v27 }
 0x1ae   :  { %v139_v28 = vpop.eup %138 }
 0x1af   :  { %v54_v29 = vmul.f32 %v139_v28, %v29_v11 }
 0x1b1   :  { %v55_v30 = vmul.f32 %v54_v29, %v14_v2 }
 0x1b3   :  { %v56_v31 = vsel %vm22_vm0, %v55_v30, 0.0 }
 0x1b4   :  { %57 = vadd.xlane.f32.xlu1 %v56_v31 }
 0x23d   :  { %v58_v32 = vpop.xlane.xlu1 %57 }
 0x23e   :  { %v59_v33 = vmul.f32 %v58_v32, %v58_v32 }
 0x240   :  { %v61_v34 = vsel %vm60_vm4, %v59_v33, 0.0 }
 0x241   :  { %62 = vadd.xlane.f32.xlu1 %v61_v34 }
 0x2ca   :  { %v63_v35 = vpop.xlane.xlu1 %62 }
 0x2cb   :  { %v64_v36 = vrot.slane %v63_v35, 4 }
 0x2cd   :  { %v65_v37 = vadd.f32 %v64_v36, %v63_v35 }
 0x2cf   :  { %v66_v38 = vrot.slane %v65_v37, 2 }
 0x2d1   :  { %v67_v39 = vadd.f32 %v66_v38, %v65_v37 }
 0x2d3   :  { %v68_v40 = vrot.slane %v67_v39, 1 }
 0x2d5   :  { %v69_v41 = vadd.f32 %v68_v40, %v67_v39 }
 0x2d7   :  { %124 = vpush %v69_v41 }
 0x308   :  { %s125_s18 = spop %124 }
 0x309   :  { %v71_v42 = vstv %s125_s18 }
 0x30a   :  { %140 = vrsqrt.f32 %v71_v42  ;;  %vm74_vm5 = vcmp.eq.f32.partialorder %v71_v42, inf  ;;  %v77_v45 = vand.u32 2147483648, %v71_v42  ;;  %vm76_vm6 = vcmp.eq.f32.partialorder %v71_v42, 0.0 }
 0x317   :  { %v141_v43 = vpop.eup %140 }
 0x318   :  { %v73_v44 = vmul.f32 %v141_v43, %v71_v42 }
 0x31a   :  { %v75_v46 = vsel %vm74_vm5, %v71_v42, %v73_v44 }
 0x31b   :  { %v78_v47 = vsel %vm76_vm6, %v77_v45, %v75_v46 }
 0x31c   :  { %126 = vpush %v78_v47 }
 0x34d   :  { %s127_s19 = spop %126 }
 0x34e   :  { %s80_s20 = smax.f32 %s169_s16, %s127_s19 }
 0x34f   :  { %v81_v48 = vstv %s80_s20 }
 0x350   :  { %142 = vrcp.f32 %v81_v48 }
 0x35d   :  { %v143_v49 = vpop.eup %142 }
 0x35e   :  { %v83_v50 = vmul.f32 %v143_v49, %v58_v32 }
 0x360   :  { %v84_v51 = vmul.f32 %v83_v50, %v58_v32  ;;  %95 = vst.msk [vmem:[%s212_s2] sm:$0xff] %vm60_vm4, %v83_v50 }
 0x362   :  { %v85_v52 = vsel %vm60_vm4, %v84_v51, 0.0 }
 0x363   :  { %86 = vadd.xlane.f32.xlu1 %v85_v52 }
 0x3ec   :  { %v87_v53 = vpop.xlane.xlu1 %86 }
 0x3ed   :  { %v88_v54 = vrot.slane %v87_v53, 4 }
 0x3ef   :  { %v89_v55 = vadd.f32 %v88_v54, %v87_v53 }
 0x3f1   :  { %v90_v56 = vrot.slane %v89_v55, 2 }
 0x3f3   :  { %v91_v57 = vadd.f32 %v90_v56, %v89_v55 }
 0x3f5   :  { %v92_v58 = vrot.slane %v91_v57, 1 }
 0x3f7   :  { %v93_v59 = vadd.f32 %v92_v58, %v91_v57 }
 0x3f9   :  { %128 = vpush %v93_v59 }
 0x42a   :  { %s129_s23 = spop %128 }
 0x42b   :  { %v96_v60 = vstv %s129_s23 }
 0x42c   :  { %144 = vrcp.f32 %v96_v60 }
 0x439   :  { %v145_v61 = vpop.eup %144 }
 0x43a   :  { %130 = vpush %v145_v61 }
 0x46b   :  { %s131_s2 = spop %130 }
 0x46c   :  { %v99_v62 = vstv %s131_s2 }
 0x46d   :  { %101 = vst.msk [vmem:[#allocation2] sm:$0x1] %vm100_vm7, %v99_v62 }
 0x46e   :  { %157 = shalt.err (!%p154_p4)
}
 0x46f   :  { %113 = dma.vmem_to_hbm [thread:$0]  %s111_s25, 16, %s213_s3, [#allocation3]  }
 0x470   :  { %166 = dma.done.wait [#allocation3], 16  }
 0x471   :  { %167 = vsyncadd [#allocation3], 4294967280 }
 0x472   :  { %119 = vsyncpa [#allocation3], 1 }

// kernel: spectral_norm_conv2d.3
= control target key start
LH: loop header
LB: loop body
LE: loop exit
PB: predicated region body
PF: predicated region fallthrough
CT: control target
= control target key end

     0   :  { %s1561_s17 = smov 0   ;;  %s1563_s18 = smov 0   ;;  %s1726_s0 = inlined_call_operand.vmem [shape: bf16[2,1,8,422], index: 0, kind: input, shape index: {}]   ;;  %s1727_s1 = inlined_call_operand.vmem [shape: bf16[9,8,8], index: 1, kind: input, shape index: {}]   ;;  %s1728_s2 = inlined_call_operand.vmem [shape: f32[8,1], index: 2, kind: input, shape index: {}]   ;;  %s1729_s3 = inlined_call_operand.<no memory space> [shape: f32[1,1], index: 3, kind: input, shape index: {}]   ;;  %s1730_s4 = inlined_call_operand.vmem [shape: f32[2,8,384], index: 4, kind: output, shape index: {}]  }
   0x1   :  { %9 = sst [smem:[#allocation2]] %s1729_s3  ;;  %s1565_s19 = smov 0  }
   0x2 LB: > { %s27_s3 = sadd.s32 1, %s1516_s18  ;;  %p1337_p0 = scmp.ge.s32.totalorder %s1520_s19, 1  ;;  %s1520_s19 = sphi %s1565_s19, %s15_s19   ;;  %s1516_s18 = sphi %s1563_s18, %s1732_s18   ;;  %s1512_s17 = sphi %s1561_s17, %s1731_s17  }
   0x3   : > { %p29_p1 = scmp.ge.s32.totalorder %s27_s3, 2  ;;  %p183_p2 = scmp.lt.s32.totalorder %s1520_s19, 3 }
   0x5   : > { %s1734_s3 = smov (%p29_p1, %s27_s3), 0  ;;  %p184_p3 = pnand %p1337_p0, %p183_p2 }
   0x6   : > { %p217_p4 = scmp.lt.s32.totalorder (!%p184_p3), %s1512_s17, 1  ;;  %s1525_s24 = smov (!%p184_p3), 127  }
   0x7   : > { %187 = sbr.rel (%p184_p3) target bundleno = 408 (0x198), region = 36  ;;  %s1526_s25 = smov (!%p184_p3), 126  }
   0x8   : > { %s1527_s26 = smov (!%p184_p3), 110   ;;  %s1528_s27 = smov (!%p184_p3), 109  }
   0x9   : > { %s1529_s28 = smov (!%p184_p3), 108   ;;  %s1530_s29 = smov (!%p184_p3), 92  }
   0xa   : > { %s1531_s30 = smov (!%p184_p3), 91   ;;  %s1532_s5 = smov (!%p184_p3), 90  }
   0xc   : > { %v1522_v0 = vmov 0.0   ;;  %s1736_s17 = smov (!%p217_p4, %s1512_s17), 1  ;;  %v1523_v1 = vmov 0   ;;  %vm1524_vm0 = vmmov 0   ;;  %v1231_v8 = vld [vmem:[%s1728_s2] sm:$0xff]  ;;  %vm261_vm1 = vcmask 1039360  }
   0xd   : > { %1402 = vmatprep.subr.bf16.mxu1 %v1522_v0  ;;  %311 = vmatprep.mubr.bf16.mxu0 %v1523_v1  ;;  %s1383_s20 = sshll.u32 %s1736_s17, 4  ;;  %vm269_vm2 = vcmask 1043456   ;;  %v1341_v19 = vld [vmem:[%s1727_s1 + $0x4] sm:$0xf]  ;;  %vm265_vm3 = vcmask 64512   ;;  %vm466_vm4 = vcmask 1031168  }
   0xe   : > { %1404 = vmatprep.mubr.msk.bf16.mxu1 %vm1524_vm0, %v1522_v0  ;;  %1492 = vset.pattern.permute.xlu0 %v1523_v1  ;;  %s1590_s23 = scalar_lea.vmem %s1726_s0, %s1383_s20  ;;  %v239_v29 = vld [vmem:[%s1727_s1] sm:$0xf]  ;;  %vm576_vm5 = vcmask 900096   ;;  %v1353_v39 = vld [vmem:[%s1727_s1 + $0x8] sm:$0xf]  ;;  %vm686_vm6 = vcmask 891904  }
   0xf   : > { %v240_v2 = vld [vmem:[%s1590_s23 + $0x8] sm:$0xff]  ;;  %v237_v3 = vld [vmem:[%s1590_s23] sm:$0xff]  ;;  %vm796_vm7 = vcmask 883712   ;;  %v1361_v59 = vld [vmem:[%s1727_s1 + $0x10] sm:$0xf]  ;;  %vm906_vm8 = vcmask 752640  }
  0x10   : > { %v1344_v4 = vcombine.low %v240_v2, %v240_v2  ;;  %v1594_v5 = vcombine.low %v237_v3, %v237_v3  ;;  %v1343_v6 = vcombine.high %v237_v3, %v237_v3  ;;  %v1345_v7 = vcombine.high %v240_v2, %v240_v2  ;;  %v1497_v13 = vld [vmem:[%s1590_s23 + $0x8] ss:$0 sps:$4 sm:$0xff]   ;;  %v1357_v49 = vld [vmem:[%s1727_s1 + $0xc] sm:$0xf] }
  0x11   : > { %v373_v23 = vsel %vm269_vm2, %v1497_v13, 0  ;;  %vm1016_vm9 = vcmask 744448   ;;  %vm1126_vm10 = vcmask 736256  }
  0x12   : > { %257 = vrot.lane.b32.xlu1 %v1344_v4, %s1525_s24  ;;  %253 = vrot.lane.b32.xlu0 %v1594_v5, %s1525_s24  ;;  %v367_v21 = vsel %vm269_vm2, %v1594_v5, 0 }
  0x16   : > { %259 = vrot.lane.b32.xlu1 %v1345_v7, %s1525_s24  ;;  %255 = vrot.lane.b32.xlu0 %v1343_v6, %s1525_s24 }
  0x1a   : > { %458 = vrot.lane.b32.xlu0 %v1594_v5, %s1526_s25  ;;  %460 = vrot.lane.b32.xlu1 %v1343_v6, %s1526_s25 }
  0x1e   : > { %462 = vrot.lane.b32.xlu0 %v1344_v4, %s1526_s25  ;;  %464 = vrot.lane.b32.xlu1 %v1345_v7, %s1526_s25 }
  0x22   : > { %568 = vrot.lane.b32.xlu0 %v1594_v5, %s1527_s26  ;;  %570 = vrot.lane.b32.xlu1 %v1343_v6, %s1527_s26 }
  0x26   : > { %572 = vrot.lane.b32.xlu0 %v1344_v4, %s1527_s26  ;;  %574 = vrot.lane.b32.xlu1 %v1345_v7, %s1527_s26 }
  0x2a   : > { %678 = vrot.lane.b32.xlu0 %v1594_v5, %s1528_s27  ;;  %680 = vrot.lane.b32.xlu1 %v1343_v6, %s1528_s27 }
  0x2e   : > { %682 = vrot.lane.b32.xlu0 %v1344_v4, %s1528_s27  ;;  %684 = vrot.lane.b32.xlu1 %v1345_v7, %s1528_s27 }
  0x32   : > { %788 = vrot.lane.b32.xlu0 %v1594_v5, %s1529_s28  ;;  %790 = vrot.lane.b32.xlu1 %v1343_v6, %s1529_s28 }
  0x36   : > { %792 = vrot.lane.b32.xlu0 %v1344_v4, %s1529_s28  ;;  %794 = vrot.lane.b32.xlu1 %v1345_v7, %s1529_s28 }
  0x3a   : > { %898 = vrot.lane.b32.xlu0 %v1594_v5, %s1530_s29  ;;  %900 = vrot.lane.b32.xlu1 %v1343_v6, %s1530_s29 }
  0x3e   : > { %902 = vrot.lane.b32.xlu0 %v1344_v4, %s1530_s29  ;;  %904 = vrot.lane.b32.xlu1 %v1345_v7, %s1530_s29  ;;  %s1226_s29 = sld [smem:[#allocation2]] }
  0x42   : > { %1008 = vrot.lane.b32.xlu0 %v1594_v5, %s1531_s30  ;;  %1010 = vrot.lane.b32.xlu1 %v1343_v6, %s1531_s30 }
  0x46   : > { %1012 = vrot.lane.b32.xlu0 %v1344_v4, %s1531_s30  ;;  %1014 = vrot.lane.b32.xlu1 %v1345_v7, %s1531_s30  ;;  %s1456_s30 = smul.u32 24, %s1736_s17 }
  0x48   : > { %s234_s7 = scalar_lea.vmem %s1730_s4, %s1456_s30 }
  0x4a   : > { %1118 = vrot.lane.b32.xlu0 %v1594_v5, %s1532_s5  ;;  %1120 = vrot.lane.b32.xlu1 %v1343_v6, %s1532_s5 }
  0x4e   : > { %1122 = vrot.lane.b32.xlu0 %v1344_v4, %s1532_s5  ;;  %1124 = vrot.lane.b32.xlu1 %v1345_v7, %s1532_s5  ;;  %v1365_v7 = vld [vmem:[%s1727_s1 + $0x14] sm:$0xf] }
  0x52   : > { %1234 = vperm.xlu0 %1492, %v1231_v8  }
  0x84   : > { %v258_v9 = vpop.permute.xlu1 %257  ;;  %v254_v10 = vpop.permute.xlu0 %253 }
  0x88   : > { %v260_v11 = vpop.permute.xlu1 %259  ;;  %v256_v12 = vpop.permute.xlu0 %255 }
  0x89   : > { %v263_v14 = vsel %vm261_vm1, %v256_v12, %v258_v9  ;;  %v262_v15 = vsel %vm261_vm1, %v254_v10, %v256_v12  ;;  %v264_v16 = vsel %vm261_vm1, %v258_v9, %v260_v11 }
  0x8a   : > { %1346 = vmatprep.subr.msk.bf16.mxu0 %vm269_vm2, %v263_v14  ;;  %v271_v17 = vsel %vm269_vm2, %v262_v15, 0  ;;  %v277_v18 = vsel %vm269_vm2, %v264_v16, 0 }
  0x8b   : > { %294 = vmatpush1.bf16.msra.mxu0 %v271_v17  ;;  %1403 = vmatpush3.bf16.msra.mxu1 %v277_v18  ;;  %v1369_v17 = vld [vmem:[%s1727_s1 + $0x18] sm:$0xf] }
  0x8c   : > { %1350 = vmatprep.subr.msk.bf16.mxu0 %vm269_vm2, %v1343_v6  ;;  %v459_v20 = vpop.permute.xlu0 %458  ;;  %1408 = vmatprep.subr.bf16.mxu1 %v1522_v0  ;;  %v461_v22 = vpop.permute.xlu1 %460 }
  0x8d   : > { %v467_v26 = vsel %vm466_vm4, %v459_v20, %v461_v22 }
  0x8e   : > { %1347 = vmatmul.mubr.msk.bf16.vlgmr.msra.gmra.mxu0 %vm265_vm3, %v1341_v19  ;;  %1405 = vmatmul.mubr.msk.bf16.vlgmr.msra.gmra.mxu1 %vm265_vm3, %v1341_v19  ;;  %v474_v30 = vsel %vm269_vm2, %v467_v26, 0 }
  0x8f   : > { %390 = vmatpush1.bf16.msra.mxu0 %v367_v21  ;;  %1409 = vmatpush3.bf16.msra.mxu1 %v373_v23 }
  0x90   : > { %v463_v24 = vpop.permute.xlu0 %462  ;;  %v465_v25 = vpop.permute.xlu1 %464  ;;  %407 = vmatprep.mubr.bf16.mxu0 %v1523_v1  ;;  %1410 = vmatprep.mubr.msk.bf16.mxu1 %vm1524_vm0, %v1522_v0 }
  0x91   : > { %v468_v27 = vsel %vm466_vm4, %v461_v22, %v463_v24  ;;  %v469_v28 = vsel %vm466_vm4, %v463_v24, %v465_v25  ;;  %1414 = vmatprep.subr.bf16.mxu1 %v1522_v0 }
  0x92   : > { %1354 = vmatprep.subr.msk.bf16.mxu0 %vm269_vm2, %v468_v27  ;;  %v480_v31 = vsel %vm269_vm2, %v469_v28, 0  ;;  %v1373_v27 = vld [vmem:[%s1727_s1 + $0x1c] sm:$0xf] }
  0x94   : > { %v569_v32 = vpop.permute.xlu0 %568  ;;  %v571_v33 = vpop.permute.xlu1 %570 }
  0x95   : > { %v577_v36 = vsel %vm576_vm5, %v569_v32, %v571_v33 }
  0x96   : > { %1411 = vmatmul.mubr.msk.bf16.vlgmr.msra.gmra.mxu1 %vm265_vm3, %v239_v29  ;;  %1351 = vmatmul.mubr.msk.bf16.vlgmr.msra.gmra.mxu0 %vm265_vm3, %v239_v29  ;;  %v584_v40 = vsel %vm269_vm2, %v577_v36, 0 }
  0x97   : > { %497 = vmatpush1.bf16.msra.mxu0 %v474_v30  ;;  %1415 = vmatpush3.bf16.msra.mxu1 %v480_v31  ;;  %v1377_v30 = vld [vmem:[%s1727_s1 + $0x20] sm:$0xf] }
  0x98   : > { %v573_v34 = vpop.permute.xlu0 %572  ;;  %v575_v35 = vpop.permute.xlu1 %574  ;;  %514 = vmatprep.mubr.bf16.mxu0 %v1523_v1  ;;  %1416 = vmatprep.mubr.msk.bf16.mxu1 %vm1524_vm0, %v1522_v0 }
  0x99   : > { %v578_v37 = vsel %vm576_vm5, %v571_v33, %v573_v34  ;;  %v579_v38 = vsel %vm576_vm5, %v573_v34, %v575_v35  ;;  %1420 = vmatprep.subr.bf16.mxu1 %v1522_v0 }
  0x9a   : > { %1358 = vmatprep.subr.msk.bf16.mxu0 %vm269_vm2, %v578_v37  ;;  %v590_v41 = vsel %vm269_vm2, %v579_v38, 0 }
  0x9c   : > { %v679_v42 = vpop.permute.xlu0 %678  ;;  %v681_v43 = vpop.permute.xlu1 %680 }
  0x9d   : > { %v687_v46 = vsel %vm686_vm6, %v679_v42, %v681_v43 }
  0x9e   : > { %1417 = vmatmul.mubr.msk.bf16.vlgmr.msra.gmra.mxu1 %vm265_vm3, %v1353_v39  ;;  %1355 = vmatmul.mubr.msk.bf16.vlgmr.msra.gmra.mxu0 %vm265_vm3, %v1353_v39  ;;  %v694_v50 = vsel %vm269_vm2, %v687_v46, 0 }
  0x9f   : > { %607 = vmatpush1.bf16.msra.mxu0 %v584_v40  ;;  %1421 = vmatpush3.bf16.msra.mxu1 %v590_v41 }
  0xa0   : > { %v683_v44 = vpop.permute.xlu0 %682  ;;  %v685_v45 = vpop.permute.xlu1 %684  ;;  %624 = vmatprep.mubr.bf16.mxu0 %v1523_v1  ;;  %1422 = vmatprep.mubr.msk.bf16.mxu1 %vm1524_vm0, %v1522_v0 }
  0xa1   : > { %v688_v47 = vsel %vm686_vm6, %v681_v43, %v683_v44  ;;  %v689_v48 = vsel %vm686_vm6, %v683_v44, %v685_v45  ;;  %1426 = vmatprep.subr.bf16.mxu1 %v1522_v0 }
  0xa2   : > { %1362 = vmatprep.subr.msk.bf16.mxu0 %vm269_vm2, %v688_v47  ;;  %v700_v51 = vsel %vm269_vm2, %v689_v48, 0 }
  0xa4   : > { %v789_v52 = vpop.permute.xlu0 %788  ;;  %v791_v53 = vpop.permute.xlu1 %790 }
  0xa5   : > { %v797_v56 = vsel %vm796_vm7, %v789_v52, %v791_v53 }
  0xa6   : > { %1423 = vmatmul.mubr.msk.bf16.vlgmr.msra.gmra.mxu1 %vm265_vm3, %v1357_v49  ;;  %1359 = vmatmul.mubr.msk.bf16.vlgmr.msra.gmra.mxu0 %vm265_vm3, %v1357_v49  ;;  %v804_v60 = vsel %vm269_vm2, %v797_v56, 0 }
  0xa7   : > { %717 = vmatpush1.bf16.msra.mxu0 %v694_v50  ;;  %1427 = vmatpush3.bf16.msra.mxu1 %v700_v51 }
  0xa8   : > { %v793_v54 = vpop.permute.xlu0 %792  ;;  %v795_v55 = vpop.permute.xlu1 %794  ;;  %734 = vmatprep.mubr.bf16.mxu0 %v1523_v1  ;;  %1428 = vmatprep.mubr.msk.bf16.mxu1 %vm1524_vm0, %v1522_v0 }
  0xa9   : > { %v798_v57 = vsel %vm796_vm7, %v791_v53, %v793_v54  ;;  %v799_v58 = vsel %vm796_vm7, %v793_v54, %v795_v55  ;;  %1432 = vmatprep.subr.bf16.mxu1 %v1522_v0 }
  0xaa   : > { %1366 = vmatprep.subr.msk.bf16.mxu0 %vm269_vm2, %v798_v57  ;;  %v810_v61 = vsel %vm269_vm2, %v799_v58, 0 }
  0xac   : > { %v899_v62 = vpop.permute.xlu0 %898  ;;  %v901_v63 = vpop.permute.xlu1 %900 }
  0xad   : > { %v907_v4 = vsel %vm906_vm8, %v899_v62, %v901_v63 }
  0xae   : > { %1429 = vmatmul.mubr.msk.bf16.vlgmr.msra.gmra.mxu1 %vm265_vm3, %v1361_v59  ;;  %1363 = vmatmul.mubr.msk.bf16.vlgmr.msra.gmra.mxu0 %vm265_vm3, %v1361_v59  ;;  %v914_v8 = vsel %vm269_vm2, %v907_v4, 0 }
  0xaf   : > { %827 = vmatpush1.bf16.msra.mxu0 %v804_v60  ;;  %1433 = vmatpush3.bf16.msra.mxu1 %v810_v61 }
  0xb0   : > { %v903_v2 = vpop.permute.xlu0 %902  ;;  %v905_v3 = vpop.permute.xlu1 %904  ;;  %844 = vmatprep.mubr.bf16.mxu0 %v1523_v1  ;;  %1434 = vmatprep.mubr.msk.bf16.mxu1 %vm1524_vm0, %v1522_v0 }
  0xb1   : > { %v908_v5 = vsel %vm906_vm8, %v901_v63, %v903_v2  ;;  %v909_v6 = vsel %vm906_vm8, %v903_v2, %v905_v3  ;;  %1438 = vmatprep.subr.bf16.mxu1 %v1522_v0 }
  0xb2   : > { %1370 = vmatprep.subr.msk.bf16.mxu0 %vm269_vm2, %v908_v5  ;;  %v920_v9 = vsel %vm269_vm2, %v909_v6, 0 }
  0xb4   : > { %v1009_v10 = vpop.permute.xlu0 %1008  ;;  %v1011_v11 = vpop.permute.xlu1 %1010 }
  0xb5   : > { %v1017_v14 = vsel %vm1016_vm9, %v1009_v10, %v1011_v11 }
  0xb6   : > { %1435 = vmatmul.mubr.msk.bf16.vlgmr.msra.gmra.mxu1 %vm265_vm3, %v1365_v7  ;;  %1367 = vmatmul.mubr.msk.bf16.vlgmr.msra.gmra.mxu0 %vm265_vm3, %v1365_v7  ;;  %v1024_v18 = vsel %vm269_vm2, %v1017_v14, 0 }
  0xb7   : > { %937 = vmatpush1.bf16.msra.mxu0 %v914_v8  ;;  %1439 = vmatpush3.bf16.msra.mxu1 %v920_v9 }
  0xb8   : > { %v1013_v12 = vpop.permute.xlu0 %1012  ;;  %v1015_v13 = vpop.permute.xlu1 %1014  ;;  %954 = vmatprep.mubr.bf16.mxu0 %v1523_v1  ;;  %1440 = vmatprep.mubr.msk.bf16.mxu1 %vm1524_vm0, %v1522_v0 }
  0xb9   : > { %v1018_v15 = vsel %vm1016_vm9, %v1011_v11, %v1013_v12  ;;  %v1019_v16 = vsel %vm1016_vm9, %v1013_v12, %v1015_v13  ;;  %1444 = vmatprep.subr.bf16.mxu1 %v1522_v0 }
  0xba   : > { %1374 = vmatprep.subr.msk.bf16.mxu0 %vm269_vm2, %v1018_v15  ;;  %v1030_v19 = vsel %vm269_vm2, %v1019_v16, 0 }
  0xbc   : > { %v1119_v20 = vpop.permute.xlu0 %1118  ;;  %v1121_v21 = vpop.permute.xlu1 %1120 }
  0xbd   : > { %v1127_v24 = vsel %vm1126_vm10, %v1119_v20, %v1121_v21 }
  0xbe   : > { %1441 = vmatmul.mubr.msk.bf16.vlgmr.msra.gmra.mxu1 %vm265_vm3, %v1369_v17  ;;  %1371 = vmatmul.mubr.msk.bf16.vlgmr.msra.gmra.mxu0 %vm265_vm3, %v1369_v17  ;;  %v1134_v28 = vsel %vm269_vm2, %v1127_v24, 0 }
  0xbf   : > { %1047 = vmatpush1.bf16.msra.mxu0 %v1024_v18  ;;  %1445 = vmatpush3.bf16.msra.mxu1 %v1030_v19 }
  0xc0   : > { %v1123_v22 = vpop.permute.xlu0 %1122  ;;  %v1125_v23 = vpop.permute.xlu1 %1124  ;;  %1064 = vmatprep.mubr.bf16.mxu0 %v1523_v1  ;;  %1446 = vmatprep.mubr.msk.bf16.mxu1 %vm1524_vm0, %v1522_v0 }
  0xc1   : > { %v1128_v25 = vsel %vm1126_vm10, %v1121_v21, %v1123_v22  ;;  %v1129_v26 = vsel %vm1126_vm10, %v1123_v22, %v1125_v23  ;;  %1450 = vmatprep.subr.bf16.mxu1 %v1522_v0 }
  0xc2   : > { %1378 = vmatprep.subr.msk.bf16.mxu0 %vm269_vm2, %v1128_v25  ;;  %v1140_v29 = vsel %vm269_vm2, %v1129_v26, 0 }
  0xc6   : > { %1375 = vmatmul.mubr.msk.bf16.vlgmr.msra.gmra.mxu0 %vm265_vm3, %v1373_v27  ;;  %1447 = vmatmul.mubr.msk.bf16.vlgmr.msra.gmra.mxu1 %vm265_vm3, %v1373_v27 }
  0xc7   : > { %1157 = vmatpush1.bf16.msra.mxu0 %v1134_v28  ;;  %1451 = vmatpush3.bf16.msra.mxu1 %v1140_v29 }
  0xc8   : > { %1174 = vmatprep.mubr.bf16.mxu0 %v1523_v1  ;;  %1452 = vmatprep.mubr.msk.bf16.mxu1 %vm1524_vm0, %v1522_v0 }
  0xce   : > { %1379 = vmatmul.mubr.msk.bf16.vlgmr.msra.gmra.mxu0 %vm265_vm3, %v1377_v30  ;;  %1453 = vmatmul.mubr.msk.bf16.vlgmr.msra.gmra.mxu1 %vm265_vm3, %v1377_v30 }
 0x14e   : > { %v313_v31 = vpop.f32.mrf.mxu0  ;;  %v354_v32 = vpop.f32.mrf.mxu1 }
 0x150   : > { %v315_v33 = vpop.f32.mrf.mxu0  ;;  %v1406_v34 = vpop.f32.mrf.mxu1 }
 0x152   : > { %v317_v35 = vpop.f32.mrf.mxu0  ;;  %v357_v36 = vpop.f32.mrf.mxu1 }
 0x154   : > { %v318_v37 = vpop.f32.mrf.mxu0  ;;  %v1407_v38 = vpop.f32.mrf.mxu1 }
 0x156   : > { %v409_v1 = vpop.f32.mrf.mxu0  ;;  %v450_v39 = vpop.f32.mrf.mxu1 }
 0x157   : > { %v410_v19 = vadd.f32 %v409_v1, %v313_v31  ;;  %v451_v20 = vadd.f32 %v450_v39, %v354_v32 }
 0x158   : > { %v411_v40 = vpop.f32.mrf.mxu0  ;;  %v1412_v0 = vpop.f32.mrf.mxu1 }
 0x159   : > { %v412_v23 = vadd.f32 %v411_v40, %v315_v33 }
 0x15a   : > { %v413_v41 = vpop.f32.mrf.mxu0  ;;  %v453_v42 = vpop.f32.mrf.mxu1 }
 0x15c   : > { %v414_v43 = vpop.f32.mrf.mxu0  ;;  %v1413_v44 = vpop.f32.mrf.mxu1 }
 0x15e   : > { %v516_v45 = vpop.f32.mrf.mxu0  ;;  %v557_v46 = vpop.f32.mrf.mxu1 }
 0x15f   : > { %v563_v24 = vadd.f32 %v516_v45, %v410_v19  ;;  %v565_v25 = vadd.f32 %v557_v46, %v451_v20 }
 0x160   : > { %v518_v47 = vpop.f32.mrf.mxu0  ;;  %v1418_v48 = vpop.f32.mrf.mxu1 }
 0x161   : > { %v564_v28 = vadd.f32 %v518_v47, %v412_v23 }
 0x162   : > { %v520_v49 = vpop.f32.mrf.mxu0  ;;  %v560_v50 = vpop.f32.mrf.mxu1 }
 0x163   : > { %v1227_v50 = vstv %s1226_s29 }
 0x164   : > { %v521_v51 = vpop.f32.mrf.mxu0  ;;  %v1419_v52 = vpop.f32.mrf.mxu1 }
 0x166   : > { %v626_v53 = vpop.f32.mrf.mxu0  ;;  %v667_v54 = vpop.f32.mrf.mxu1 }
 0x167   : > { %v673_v29 = vadd.f32 %v626_v53, %v563_v24  ;;  %v675_v30 = vadd.f32 %v667_v54, %v565_v25 }
 0x168   : > { %v628_v55 = vpop.f32.mrf.mxu0  ;;  %v1424_v56 = vpop.f32.mrf.mxu1 }
 0x169   : > { %v674_v36 = vadd.f32 %v628_v55, %v564_v28  ;;  %v1235_v55 = vpop.permute.xlu0 %1234 }
 0x16a   : > { %v630_v57 = vpop.f32.mrf.mxu0  ;;  %v670_v58 = vpop.f32.mrf.mxu1 }
 0x16c   : > { %v631_v59 = vpop.f32.mrf.mxu0  ;;  %v1425_v60 = vpop.f32.mrf.mxu1 }
 0x16e   : > { %v736_v61 = vpop.f32.mrf.mxu0  ;;  %v777_v62 = vpop.f32.mrf.mxu1 }
 0x16f   : > { %v783_v37 = vadd.f32 %v736_v61, %v673_v29  ;;  %v785_v38 = vadd.f32 %v777_v62, %v675_v30 }
 0x170   : > { %v738_v63 = vpop.f32.mrf.mxu0  ;;  %v1430_v2 = vpop.f32.mrf.mxu1 }
 0x171   : > { %v784_v31 = vadd.f32 %v738_v63, %v674_v36 }
 0x172   : > { %v740_v3 = vpop.f32.mrf.mxu0  ;;  %v780_v4 = vpop.f32.mrf.mxu1 }
 0x174   : > { %v741_v5 = vpop.f32.mrf.mxu0  ;;  %v1431_v6 = vpop.f32.mrf.mxu1 }
 0x176   : > { %v846_v7 = vpop.f32.mrf.mxu0  ;;  %v887_v8 = vpop.f32.mrf.mxu1 }
 0x177   : > { %v893_v32 = vadd.f32 %v846_v7, %v783_v37  ;;  %v895_v1 = vadd.f32 %v887_v8, %v785_v38 }
 0x178   : > { %v848_v9 = vpop.f32.mrf.mxu0  ;;  %v1436_v10 = vpop.f32.mrf.mxu1 }
 0x179   : > { %v894_v40 = vadd.f32 %v848_v9, %v784_v31 }
 0x17a   : > { %v850_v11 = vpop.f32.mrf.mxu0  ;;  %v890_v12 = vpop.f32.mrf.mxu1 }
 0x17c   : > { %v851_v13 = vpop.f32.mrf.mxu0  ;;  %v1437_v14 = vpop.f32.mrf.mxu1 }
 0x17e   : > { %v956_v15 = vpop.f32.mrf.mxu0  ;;  %v997_v16 = vpop.f32.mrf.mxu1 }
 0x17f   : > { %v1003_v42 = vadd.f32 %v956_v15, %v893_v32  ;;  %v1005_v43 = vadd.f32 %v997_v16, %v895_v1 }
 0x180   : > { %v958_v17 = vpop.f32.mrf.mxu0  ;;  %v1442_v18 = vpop.f32.mrf.mxu1 }
 0x181   : > { %v1004_v46 = vadd.f32 %v958_v17, %v894_v40 }
 0x182   : > { %v960_v21 = vpop.f32.mrf.mxu0  ;;  %v1000_v22 = vpop.f32.mrf.mxu1 }
 0x184   : > { %v961_v26 = vpop.f32.mrf.mxu0  ;;  %v1443_v27 = vpop.f32.mrf.mxu1 }
 0x186   : > { %v1066_v34 = vpop.f32.mrf.mxu0  ;;  %v1107_v35 = vpop.f32.mrf.mxu1 }
 0x187   : > { %v1113_v47 = vadd.f32 %v1066_v34, %v1003_v42  ;;  %v1115_v48 = vadd.f32 %v1107_v35, %v1005_v43 }
 0x188   : > { %v1068_v0 = vpop.f32.mrf.mxu0  ;;  %v1448_v41 = vpop.f32.mrf.mxu1 }
 0x189   : > { %v1114_v52 = vadd.f32 %v1068_v0, %v1004_v46 }
 0x18a   : > { %v1070_v33 = vpop.f32.mrf.mxu0  ;;  %v1110_v39 = vpop.f32.mrf.mxu1 }
 0x18c   : > { %v1071_v44 = vpop.f32.mrf.mxu0  ;;  %v1449_v45 = vpop.f32.mrf.mxu1 }
 0x18e   : > { %v1176_v49 = vpop.f32.mrf.mxu0  ;;  %v1217_v51 = vpop.f32.mrf.mxu1 }
 0x18f   : > { %v1223_v53 = vadd.f32 %v1176_v49, %v1113_v47  ;;  %v1225_v54 = vadd.f32 %v1217_v51, %v1115_v48 }
 0x190   : > { %v1178_v56 = vpop.f32.mrf.mxu0  ;;  %v1454_v57 = vpop.f32.mrf.mxu1 }
 0x191   : > { %v1228_v58 = vmul.f32 %v1227_v50, %v1223_v53  ;;  %v1230_v59 = vmul.f32 %v1227_v50, %v1225_v54  ;;  %v1224_v60 = vadd.f32 %v1178_v56, %v1114_v52 }
 0x192   : > { %v1220_v61 = vpop.f32.mrf.mxu1  ;;  %v1180_v62 = vpop.f32.mrf.mxu0 }
 0x193   : > { %v1229_v63 = vmul.f32 %v1227_v50, %v1224_v60  ;;  %v1237_v2 = vadd.f32 %v1235_v55, %v1228_v58  ;;  %v1239_v3 = vadd.f32 %v1235_v55, %v1230_v59 }
 0x194   : > { %v1181_v4 = vpop.f32.mrf.mxu0  ;;  %v1455_v5 = vpop.f32.mrf.mxu1 }
 0x195   : > { %v1238_v6 = vadd.f32 %v1235_v55, %v1229_v63  ;;  %1240 = vst [vmem:[%s234_s7] sm:$0xff] %v1237_v2  ;;  %1242 = vst [vmem:[%s234_s7 + $0x10] sm:$0xff] %v1239_v3 }
 0x197   : > { %1241 = vst [vmem:[%s234_s7 + $0x8] sm:$0xff] %v1238_v6 }
 0x198 PF: > { %s15_s19 = sadd.s32 1, %s1520_s19   ;;  %s1731_s17 = smov %s1516_s18 }
 0x199   : > { %p12_p5 = scmp.ge.s32.totalorder %s15_s19, 4   ;;  %s1732_s18 = smov %s1734_s3 }
 0x19b   :  { %14 = sbr.rel (!%p12_p5) target bundleno = 2 (0x2), region = 74 }

</bundles_post_ra>
